<compile_context>
chip_gen: v6e
topology: v6e:2x2x1
jax: 0.10.0
libtpu: 0.0.40
codegen_flags: <defaults>
</compile_context>

<pallas_src>
import functools

import jax
import jax.numpy as jnp
from jax.experimental import pallas as pl
from jax.experimental.pallas import tpu as pltpu

BN_EPS = 0.001   # matches nn.BatchNorm1d(..., eps=0.001)
LANE = 128
SUBLANE = 8


def _round_up(x, m):
    return ((x + m - 1) // m) * m


# ---------------------------------------------------------------------------
# Fused kernel: all layers, one batch tile per grid step.
# ---------------------------------------------------------------------------
def _make_fused_kernel(n_layers, has_cat):
    """refs = [x, (onehot), {w_x_l, (w_cat_l), b_l} * n_layers, out]."""

    def kernel(*refs):
        idx = 0
        x_ref = refs[idx]; idx += 1
        oh = None
        if has_cat:
            oh = refs[idx][...]           # (TM, n_cat_pad) bf16, resident
            idx += 1
        o_ref = refs[-1]

        h = x_ref[...]                    # (TM, d_in_pad) f32
        for _ in range(n_layers):
            wx_ref = refs[idx]; idx += 1  # (d_in_pad, d_out_pad) bf16
            wc_ref = None
            if has_cat:
                wc_ref = refs[idx]; idx += 1
            b_ref = refs[idx]; idx += 1   # (1, d_out_pad) f32 (BN folded)

            # MXU matmul with bf16 operands, f32 accumulation.
            acc = jnp.dot(h.astype(jnp.bfloat16), wx_ref[...],
                          preferred_element_type=jnp.float32)
            if has_cat:
                acc = acc + jnp.dot(oh, wc_ref[...],
                                    preferred_element_type=jnp.float32)
            # Folded Linear-bias + BatchNorm affine, then ReLU (f32 epilogue).
            h = jnp.maximum(acc + b_ref[...], 0.0)
            # Dropout: identity in eval mode.

        o_ref[...] = h.astype(o_ref.dtype)

    return kernel


# ---------------------------------------------------------------------------
# Parameter construction (synthetic, shapes follow FCLayers.__init__)
# ---------------------------------------------------------------------------
def make_raw_params(key, n_in, n_out, n_cat_list, n_layers, n_hidden):
    n_cat_list = [] if n_cat_list is None else [c if c > 1 else 0 for c in n_cat_list]
    layers_dim = [n_in] + (n_layers - 1) * [n_hidden] + [n_out]
    params = []
    for d_in, d_out in zip(layers_dim[:-1], layers_dim[1:]):
        d_in_total = d_in + sum(n_cat_list)
        key, kw, kb, kg, kbeta, km, kv = jax.random.split(key, 7)
        w = jax.random.normal(kw, (d_in_total, d_out), jnp.float32) * 0.1
        b = jax.random.normal(kb, (1, d_out), jnp.float32) * 0.05
        gamma = 1.0 + 0.1 * jax.random.normal(kg, (1, d_out), jnp.float32)
        beta = 0.05 * jax.random.normal(kbeta, (1, d_out), jnp.float32)
        mean = 0.05 * jax.random.normal(km, (1, d_out), jnp.float32)
        var = 1.0 + jnp.abs(0.1 * jax.random.normal(kv, (1, d_out), jnp.float32))
        params.append(dict(w=w, b=b, gamma=gamma, beta=beta, mean=mean, var=var))
    return params, n_cat_list


def fold_and_pad_params(raw_params, n_in, n_out, eff_cat_list, n_layers, n_hidden):
    """Fold BN into weights/bias, split the covariate weight block, pad to 128 lanes."""
    n_cat_sum = sum(eff_cat_list)
    n_cat_pad = _round_up(n_cat_sum, LANE) if n_cat_sum > 0 else 0
    layers_dim = [n_in] + (n_layers - 1) * [n_hidden] + [n_out]
    layers_dim_pad = [_round_up(d, LANE) for d in layers_dim]

    packed = []
    for li, p in enumerate(raw_params):
        d_in_l, d_out_l = layers_dim[li], layers_dim[li + 1]
        d_in_pad, d_out_pad = layers_dim_pad[li], layers_dim_pad[li + 1]

        scale = p["gamma"] * jax.lax.rsqrt(p["var"] + BN_EPS)       # (1, d_out_l)
        w_folded = p["w"] * scale                                   # (d_in_l+n_cat, d_out_l)
        b_folded = (p["b"] - p["mean"]) * scale + p["beta"]         # (1, d_out_l)

        w_x = w_folded[:d_in_l]
        w_cat = w_folded[d_in_l:]

        w_x_pad = jnp.zeros((d_in_pad, d_out_pad), jnp.bfloat16)
        w_x_pad = w_x_pad.at[:d_in_l, :d_out_l].set(w_x.astype(jnp.bfloat16))
        b_pad = jnp.zeros((1, d_out_pad), jnp.float32)
        b_pad = b_pad.at[:, :d_out_l].set(b_folded)

        entry = dict(w_x=w_x_pad, b=b_pad)
        if n_cat_pad:
            w_cat_pad = jnp.zeros((n_cat_pad, d_out_pad), jnp.bfloat16)
            w_cat_pad = w_cat_pad.at[:n_cat_sum, :d_out_l].set(w_cat.astype(jnp.bfloat16))
            entry["w_cat"] = w_cat_pad
        packed.append(entry)
    return packed


# ---------------------------------------------------------------------------
# Forward pass
# ---------------------------------------------------------------------------
@functools.partial(jax.jit, static_argnames=("n_cat_list", "n_out"))
def fc_layers_forward(x, cats, params, *, n_cat_list, n_out):
    batch, n_in = x.shape
    d_in_pad = params[0]["w_x"].shape[0]
    d_out_pad = params[-1]["w_x"].shape[1]
    has_cat = "w_cat" in params[0]
    n_cat_pad = params[0]["w_cat"].shape[0] if has_cat else 0

    # Batch tiling: multiples of 8 sublanes; cap tile at 256 rows (fits VMEM
    # comfortably on v5e/v6e and v7x's smaller 64 MiB VMEM).
    tm = 256 if batch >= 256 else _round_up(batch, SUBLANE)
    b_pad = _round_up(batch, tm)

    x_pad = jnp.zeros((b_pad, d_in_pad), jnp.float32).at[:batch, :n_in].set(x)

    inputs = [x_pad]
    in_specs = [pl.BlockSpec((tm, d_in_pad), lambda i: (i, 0))]

    if has_cat:
        oh_list = [jax.nn.one_hot(cat, n_cat, dtype=jnp.float32)
                   for n_cat, cat in zip(n_cat_list, cats) if n_cat > 1]
        oh = jnp.concatenate(oh_list, axis=-1)
        oh_pad = jnp.zeros((b_pad, n_cat_pad), jnp.bfloat16)
        oh_pad = oh_pad.at[:batch, :oh.shape[1]].set(oh.astype(jnp.bfloat16))
        inputs.append(oh_pad)
        in_specs.append(pl.BlockSpec((tm, n_cat_pad), lambda i: (i, 0)))

    for p in params:
        inputs.append(p["w_x"])
        in_specs.append(pl.BlockSpec(p["w_x"].shape, lambda i: (0, 0)))   # VMEM-resident
        if has_cat:
            inputs.append(p["w_cat"])
            in_specs.append(pl.BlockSpec(p["w_cat"].shape, lambda i: (0, 0)))
        inputs.append(p["b"])
        in_specs.append(pl.BlockSpec(p["b"].shape, lambda i: (0, 0)))

    kernel = _make_fused_kernel(len(params), has_cat)

    out_pad = pl.pallas_call(
        kernel,
        out_shape=jax.ShapeDtypeStruct((b_pad, d_out_pad), jnp.float32),
        grid=(b_pad // tm,),
        in_specs=in_specs,
        out_specs=pl.BlockSpec((tm, d_out_pad), lambda i: (i, 0)),
        compiler_params=pltpu.CompilerParams(
            dimension_semantics=("parallel",)),   # lets v7x shard over both TCs
    )(*inputs)

    return out_pad[:batch, :n_out]


# ---------------------------------------------------------------------------
# Pure-JAX reference (unfused, f32) for correctness checking
# ---------------------------------------------------------------------------
def fc_layers_reference(x, cats, raw_params, eff_cat_list):
    oh_list = [jax.nn.one_hot(c, n, dtype=x.dtype)
               for n, c in zip(eff_cat_list, cats) if n > 1]
    for p in raw_params:
        x_in = jnp.concatenate([x] + oh_list, axis=-1) if oh_list else x
        h = x_in @ p["w"] + p["b"]
        h = (h - p["mean"]) * jax.lax.rsqrt(p["var"] + BN_EPS) * p["gamma"] + p["beta"]
        x = jnp.maximum(h, 0.0)   # ReLU; dropout is identity in eval mode
    return x


if __name__ == "__main__":
    # Small config consistent with the module's constructor.
    n_in, n_out, n_hidden, n_layers = 16, 8, 32, 2
    n_cat_list = [3, 1]          # the "1" entry collapses to 0, as in FCLayers
    batch = 8

    key = jax.random.PRNGKey(0)
    key, kx, kc = jax.random.split(key, 3)
    raw_params, eff_cat_list = make_raw_params(
        key, n_in, n_out, n_cat_list, n_layers, n_hidden)
    params = fold_and_pad_params(
        raw_params, n_in, n_out, eff_cat_list, n_layers, n_hidden)

    x = jax.random.normal(kx, (batch, n_in), jnp.float32)
    cat0 = jax.random.randint(kc, (batch,), 0, 3, jnp.int32)   # 3-class covariate
    cat1 = jnp.zeros((batch,), jnp.int32)                      # ignored (n_cat <= 1)

    out = fc_layers_forward(x, (cat0, cat1), params,
                            n_cat_list=tuple(eff_cat_list), n_out=n_out)
    out = jax.block_until_ready(out)

    ref = fc_layers_reference(x, (cat0, cat1), raw_params, eff_cat_list)

    assert out.shape == (batch, n_out)
    assert bool(jnp.all(jnp.isfinite(out)))
    assert bool(jnp.all(out >= 0.0))                 # ReLU output
    max_err = float(jnp.max(jnp.abs(out - ref)))
    assert max_err < 0.05, f"mismatch vs reference: {max_err}"
    print("KERNEL_OK")
</pallas_src>

<mosaic_0001>
module attributes {stable_mosaic.version = 11 : i64} {
  func.func @kernel(%arg0: i32, %arg1: memref<8x128xf32, #tpu.memory_space<vmem>>, %arg2: memref<8x128xbf16, #tpu.memory_space<vmem>>, %arg3: memref<128x128xbf16, #tpu.memory_space<vmem>>, %arg4: memref<128x128xbf16, #tpu.memory_space<vmem>>, %arg5: memref<1x128xf32, #tpu.memory_space<vmem>>, %arg6: memref<128x128xbf16, #tpu.memory_space<vmem>>, %arg7: memref<128x128xbf16, #tpu.memory_space<vmem>>, %arg8: memref<1x128xf32, #tpu.memory_space<vmem>>, %arg9: memref<8x128xf32, #tpu.memory_space<vmem>>) attributes {dimension_semantics = [#tpu.dimension_semantics<parallel>], iteration_bounds = array<i64: 1>, scalar_prefetch = 0 : i64, scratch_operands = 0 : i64, tpu.core_type = #tpu.core_type<tc>, window_params = [{transform_indices = @transform_0, window_bounds = array<i64: 8, 128>}, {transform_indices = @transform_1, window_bounds = array<i64: 8, 128>}, {pipeline_mode = #tpu.pipeline_mode<synchronous>, transform_indices = @transform_2, window_bounds = array<i64: 128, 128>}, {pipeline_mode = #tpu.pipeline_mode<synchronous>, transform_indices = @transform_3, window_bounds = array<i64: 128, 128>}, {pipeline_mode = #tpu.pipeline_mode<synchronous>, transform_indices = @transform_4, window_bounds = array<i64: 1, 128>}, {pipeline_mode = #tpu.pipeline_mode<synchronous>, transform_indices = @transform_5, window_bounds = array<i64: 128, 128>}, {pipeline_mode = #tpu.pipeline_mode<synchronous>, transform_indices = @transform_6, window_bounds = array<i64: 128, 128>}, {pipeline_mode = #tpu.pipeline_mode<synchronous>, transform_indices = @transform_7, window_bounds = array<i64: 1, 128>}, {transform_indices = @transform_8, window_bounds = array<i64: 8, 128>}]} {
    %c0 = arith.constant 0 : index
    %c0_0 = arith.constant 0 : index
    %0 = vector.load %arg2[%c0, %c0_0] : memref<8x128xbf16, #tpu.memory_space<vmem>>, vector<8x128xbf16>
    %c0_1 = arith.constant 0 : index
    %c0_2 = arith.constant 0 : index
    %1 = vector.load %arg1[%c0_1, %c0_2] : memref<8x128xf32, #tpu.memory_space<vmem>>, vector<8x128xf32>
    %2 = arith.truncf %1 : vector<8x128xf32> to vector<8x128xbf16>
    %c0_3 = arith.constant 0 : index
    %c0_4 = arith.constant 0 : index
    %3 = vector.load %arg3[%c0_3, %c0_4] : memref<128x128xbf16, #tpu.memory_space<vmem>>, vector<128x128xbf16>
    %cst = arith.constant dense<0.000000e+00> : vector<8x128xf32>
    %4 = tpu.matmul %2, %3, %cst {dimension_numbers = #tpu.dot_dimension_numbers<[1], [0], [0], [1], [0, 0, 1, 1], [], []>} : vector<8x128xbf16>, vector<128x128xbf16>, vector<8x128xf32> -> vector<8x128xf32>
    %c0_5 = arith.constant 0 : index
    %c0_6 = arith.constant 0 : index
    %5 = vector.load %arg4[%c0_5, %c0_6] : memref<128x128xbf16, #tpu.memory_space<vmem>>, vector<128x128xbf16>
    %cst_7 = arith.constant dense<0.000000e+00> : vector<8x128xf32>
    %6 = tpu.matmul %0, %5, %cst_7 {dimension_numbers = #tpu.dot_dimension_numbers<[1], [0], [0], [1], [0, 0, 1, 1], [], []>} : vector<8x128xbf16>, vector<128x128xbf16>, vector<8x128xf32> -> vector<8x128xf32>
    %7 = arith.addf %4, %6 : vector<8x128xf32>
    %c0_8 = arith.constant 0 : index
    %c0_9 = arith.constant 0 : index
    %8 = vector.load %arg5[%c0_8, %c0_9] : memref<1x128xf32, #tpu.memory_space<vmem>>, vector<1x128xf32>
    %9 = vector.broadcast %8 : vector<1x128xf32> to vector<8x128xf32>
    %10 = arith.addf %7, %9 : vector<8x128xf32>
    %cst_10 = arith.constant 0.000000e+00 : f32
    %11 = vector.broadcast %cst_10 : f32 to vector<8x128xf32>
    %12 = arith.maximumf %10, %11 : vector<8x128xf32>
    %13 = arith.truncf %12 : vector<8x128xf32> to vector<8x128xbf16>
    %c0_11 = arith.constant 0 : index
    %c0_12 = arith.constant 0 : index
    %14 = vector.load %arg6[%c0_11, %c0_12] : memref<128x128xbf16, #tpu.memory_space<vmem>>, vector<128x128xbf16>
    %cst_13 = arith.constant dense<0.000000e+00> : vector<8x128xf32>
    %15 = tpu.matmul %13, %14, %cst_13 {dimension_numbers = #tpu.dot_dimension_numbers<[1], [0], [0], [1], [0, 0, 1, 1], [], []>} : vector<8x128xbf16>, vector<128x128xbf16>, vector<8x128xf32> -> vector<8x128xf32>
    %c0_14 = arith.constant 0 : index
    %c0_15 = arith.constant 0 : index
    %16 = vector.load %arg7[%c0_14, %c0_15] : memref<128x128xbf16, #tpu.memory_space<vmem>>, vector<128x128xbf16>
    %cst_16 = arith.constant dense<0.000000e+00> : vector<8x128xf32>
    %17 = tpu.matmul %0, %16, %cst_16 {dimension_numbers = #tpu.dot_dimension_numbers<[1], [0], [0], [1], [0, 0, 1, 1], [], []>} : vector<8x128xbf16>, vector<128x128xbf16>, vector<8x128xf32> -> vector<8x128xf32>
    %18 = arith.addf %15, %17 : vector<8x128xf32>
    %c0_17 = arith.constant 0 : index
    %c0_18 = arith.constant 0 : index
    %19 = vector.load %arg8[%c0_17, %c0_18] : memref<1x128xf32, #tpu.memory_space<vmem>>, vector<1x128xf32>
    %20 = vector.broadcast %19 : vector<1x128xf32> to vector<8x128xf32>
    %21 = arith.addf %18, %20 : vector<8x128xf32>
    %cst_19 = arith.constant 0.000000e+00 : f32
    %22 = vector.broadcast %cst_19 : f32 to vector<8x128xf32>
    %23 = arith.maximumf %21, %22 : vector<8x128xf32>
    %c0_20 = arith.constant 0 : index
    %c0_21 = arith.constant 0 : index
    %24 = vector.load %arg9[%c0_20, %c0_21] : memref<8x128xf32, #tpu.memory_space<vmem>>, vector<8x128xf32>
    tpu.vector_store %arg9[%c0_20, %c0_21], %23 {strides = array<i32>} : memref<8x128xf32, #tpu.memory_space<vmem>>, vector<8x128xf32>,
    return
  }
  func.func @transform_0(%arg0: i32) -> (i32, i32) {
    %c0_i32 = arith.constant 0 : i32
    %c0_i32_0 = arith.constant 0 : i32
    return %arg0, %c0_i32 : i32, i32
  }
  func.func @transform_1(%arg0: i32) -> (i32, i32) {
    %c0_i32 = arith.constant 0 : i32
    %c0_i32_0 = arith.constant 0 : i32
    return %arg0, %c0_i32 : i32, i32
  }
  func.func @transform_2(%arg0: i32) -> (i32, i32) {
    %c0_i32 = arith.constant 0 : i32
    %c0_i32_0 = arith.constant 0 : i32
    %c0_i32_1 = arith.constant 0 : i32
    return %c0_i32, %c0_i32_0 : i32, i32
  }
  func.func @transform_3(%arg0: i32) -> (i32, i32) {
    %c0_i32 = arith.constant 0 : i32
    %c0_i32_0 = arith.constant 0 : i32
    %c0_i32_1 = arith.constant 0 : i32
    return %c0_i32, %c0_i32_0 : i32, i32
  }
  func.func @transform_4(%arg0: i32) -> (i32, i32) {
    %c0_i32 = arith.constant 0 : i32
    %c0_i32_0 = arith.constant 0 : i32
    %c0_i32_1 = arith.constant 0 : i32
    return %c0_i32, %c0_i32_0 : i32, i32
  }
  func.func @transform_5(%arg0: i32) -> (i32, i32) {
    %c0_i32 = arith.constant 0 : i32
    %c0_i32_0 = arith.constant 0 : i32
    %c0_i32_1 = arith.constant 0 : i32
    return %c0_i32, %c0_i32_0 : i32, i32
  }
  func.func @transform_6(%arg0: i32) -> (i32, i32) {
    %c0_i32 = arith.constant 0 : i32
    %c0_i32_0 = arith.constant 0 : i32
    %c0_i32_1 = arith.constant 0 : i32
    return %c0_i32, %c0_i32_0 : i32, i32
  }
  func.func @transform_7(%arg0: i32) -> (i32, i32) {
    %c0_i32 = arith.constant 0 : i32
    %c0_i32_0 = arith.constant 0 : i32
    %c0_i32_1 = arith.constant 0 : i32
    return %c0_i32, %c0_i32_0 : i32, i32
  }
  func.func @transform_8(%arg0: i32) -> (i32, i32) {
    %c0_i32 = arith.constant 0 : i32
    %c0_i32_0 = arith.constant 0 : i32
    return %arg0, %c0_i32 : i32, i32
  }
}

</mosaic_0001>

<bundles_post_ra>
// kernel: fc_layers_forward.1
= control target key start
LH: loop header
LB: loop body
LE: loop exit
PB: predicated region body
PF: predicated region fallthrough
CT: control target
= control target key end

     0   :  { %13 = vsyncpa [#allocation3], 0  ;;  %s981_s0 = inlined_call_operand.vmem [shape: f32[8,128], index: 0, kind: input, shape index: {}]   ;;  %s982_s1 = inlined_call_operand.vmem [shape: bf16[8,128], index: 1, kind: input, shape index: {}]   ;;  %s983_s2 = inlined_call_operand.hbm [shape: bf16[128,128], index: 2, kind: input, shape index: {}]   ;;  %s984_s3 = inlined_call_operand.hbm [shape: bf16[128,128], index: 3, kind: input, shape index: {}]   ;;  %s985_s4 = inlined_call_operand.vmem [shape: f32[1,128], index: 4, kind: input, shape index: {}]   ;;  %s986_s5 = inlined_call_operand.vmem [shape: bf16[128,128], index: 5, kind: input, shape index: {}]   ;;  %s987_s6 = inlined_call_operand.hbm [shape: bf16[128,128], index: 6, kind: input, shape index: {}]   ;;  %s988_s7 = inlined_call_operand.hbm [shape: f32[1,128], index: 7, kind: input, shape index: {}]   ;;  %s989_s8 = inlined_call_operand.hbm [shape: f32[8,128], index: 8, kind: output, shape index: {}]  }
   0x1   :  { %14 = vsyncpa [#allocation6], 0 }
   0x2   :  { %15 = vsyncpa [#allocation9], 0 }
   0x3   :  { %16 = vsyncpa [#allocation4], 0  ;;  %s839_s27 = smov [#allocation5]   ;;  %s840_s29 = smov [#allocation2]  }
   0x4   :  { %s38_s28 = sshll.u32 %s839_s27, 4  ;;  %s26_s30 = sshll.u32 %s840_s29, 4  ;;  %s39_s28 = int_to_ptr.vmem [resolvable:$true] %s38_s28  ;;  %s27_s30 = int_to_ptr.vmem [resolvable:$true] %s26_s30 }
   0x5   :  { %s739_s9 = scalar_lea.vmem %s39_s28, 1024  ;;  %p744_p1 = scmp.lt.s32.totalorder %s39_s28, %s39_s28 }
   0x6   :  { %p740_p0 = scmp.ne.s32.totalorder %s39_s28, %s739_s9  ;;  %p745_p2 = scmp.lt.s32.totalorder %s739_s9, %s739_s9 }
   0x8   :  { %p746_p3 = por %p745_p2, %p744_p1 }
   0xa   :  { %p747_p4 = pnand %p746_p3, %p740_p0 }
   0xc   :  { %750 = shalt.err (!%p747_p4)
}
   0xd   :  { %s841_s10 = smov 64   ;;  %s842_s11 = smov 4  }
   0xe   :  { %44 = dma.hbm_to_vmem [thread:$0]  %s984_s3, 1024, %s39_s28, [#allocation6], %s841_s10, %s841_s10, %s842_s11  }
   0xf   :  { %s759_s14 = scalar_lea.vmem %s27_s30, 1024  ;;  %p764_p6 = scmp.lt.s32.totalorder %s27_s30, %s27_s30 }
  0x10   :  { %p760_p5 = scmp.ne.s32.totalorder %s27_s30, %s759_s14  ;;  %p765_p7 = scmp.lt.s32.totalorder %s759_s14, %s759_s14 }
  0x12   :  { %p766_p8 = por %p765_p7, %p764_p6 }
  0x14   :  { %p767_p9 = pnand %p766_p8, %p760_p5 }
  0x16   :  { %770 = shalt.err (!%p767_p9)
}
  0x17   :  { %32 = dma.hbm_to_vmem [thread:$0]  %s983_s2, 1024, %s27_s30, [#allocation3], %s841_s10, %s841_s10, %s842_s11  }
  0x18   :  { %s843_s17 = smov [#allocation7]   ;;  %s844_s19 = smov [#allocation8]  }
  0x19   :  { %s54_s18 = sshll.u32 %s843_s17, 4  ;;  %s67_s20 = sshll.u32 %s844_s19, 4  ;;  %s55_s18 = int_to_ptr.vmem [resolvable:$true] %s54_s18  ;;  %s68_s20 = int_to_ptr.vmem [resolvable:$true] %s67_s20 }
  0x1a   :  { %s779_s21 = scalar_lea.vmem %s55_s18, 1024  ;;  %p784_p11 = scmp.lt.s32.totalorder %s55_s18, %s55_s18 }
  0x1b   :  { %p780_p10 = scmp.ne.s32.totalorder %s55_s18, %s779_s21  ;;  %p785_p12 = scmp.lt.s32.totalorder %s779_s21, %s779_s21 }
  0x1d   :  { %p786_p13 = por %p785_p12, %p784_p11 }
  0x1f   :  { %p787_p0 = pnand %p786_p13, %p780_p10 }
  0x21   :  { %790 = shalt.err (!%p787_p0)
}
  0x22   :  { %60 = dma.hbm_to_vmem [thread:$0]  %s987_s6, 1024, %s55_s18, [#allocation6], %s841_s10, %s841_s10, %s842_s11  }
  0x23   :  { %s799_s23 = scalar_lea.vmem %s68_s20, 16  ;;  %s803_s2 = scalar_lea.vmem %s68_s20, 32 }
  0x24   :  { %p800_p1 = scmp.ne.s32.totalorder %s68_s20, %s799_s23  ;;  %p804_p2 = scmp.lt.s32.totalorder %s68_s20, %s68_s20 }
  0x25   :  { %p805_p3 = scmp.lt.s32.totalorder %s803_s2, %s799_s23 }
  0x27   :  { %p806_p4 = por %p805_p3, %p804_p2 }
  0x29   :  { %p807_p5 = pnand %p806_p4, %p800_p1 }
  0x2b   :  { %810 = shalt.err (!%p807_p5)
}
  0x2c   :  { %70 = dma.hbm_to_vmem [thread:$0]  %s988_s7, 16, %s68_s20, [#allocation9]  }
  0x2d   :  { %831 = dma.done.wait [#allocation3], 1024  }
  0x2e   :  { %832 = vsyncadd [#allocation3], 4294966272 }
  0x2f   :  { %833 = dma.done.wait [#allocation6], 2048  }
  0x30   :  { %834 = vsyncadd [#allocation6], 4294965248 }
  0x31   :  { %835 = dma.done.wait [#allocation9], 16  }
  0x32   :  { %836 = vsyncadd [#allocation9], 4294967280  ;;  %v845_v0 = vmov 0.0   ;;  %vm846_vm0 = vmmov 0   ;;  %v699_v1 = vld [vmem:[#allocation5 + $0x38] sm:$0xff]   ;;  %v701_v3 = vld [vmem:[#allocation5 + $0x30] sm:$0xff]  }
  0x33   :  { %610 = vmatprep.subr.bf16.mxu0 %v845_v0  ;;  %630 = vmatprep.subr.bf16.mxu1 %v845_v0  ;;  %v700_v2 = vld [vmem:[#allocation2 + $0x38] sm:$0xff]   ;;  %v702_v4 = vld [vmem:[#allocation2 + $0x30] sm:$0xff]   ;;  %v703_v5 = vld [vmem:[#allocation5 + $0x28] sm:$0xff]  }
  0x34   :  { %626 = vmatprep.mubr.msk.bf16.mxu0 %vm846_vm0, %v845_v0  ;;  %646 = vmatprep.mubr.msk.bf16.mxu1 %vm846_vm0, %v845_v0  ;;  %v704_v6 = vld [vmem:[#allocation2 + $0x28] sm:$0xff]   ;;  %v705_v7 = vld [vmem:[#allocation5 + $0x20] sm:$0xff]   ;;  %v707_v9 = vld [vmem:[#allocation5 + $0x18] sm:$0xff]  }
  0x35   :  { %611 = vmatpush3.bf16.msra.mxu0 %v699_v1  ;;  %631 = vmatpush3.bf16.msra.mxu1 %v700_v2  ;;  %v706_v8 = vld [vmem:[#allocation2 + $0x20] sm:$0xff]   ;;  %v708_v10 = vld [vmem:[#allocation2 + $0x18] sm:$0xff]   ;;  %v709_v11 = vld [vmem:[#allocation5 + $0x10] sm:$0xff]  }
  0x36   :  { %612 = vmatprep.subr.bf16.mxu0 %v845_v0  ;;  %632 = vmatprep.subr.bf16.mxu1 %v845_v0  ;;  %v710_v12 = vld [vmem:[#allocation2 + $0x10] sm:$0xff]   ;;  %v711_v13 = vld [vmem:[#allocation5 + $0x8] sm:$0xff]   ;;  %v713_v15 = vld [vmem:[#allocation5] sm:$0xff]  }
  0x37   :  { %v712_v14 = vld [vmem:[#allocation2 + $0x8] sm:$0xff]   ;;  %v714_v16 = vld [vmem:[#allocation2] sm:$0xff]   ;;  %v715_v19 = vld [vmem:[#allocation7 + $0x38] sm:$0xff]  }
  0x38   :  { %v85_v17 = vld [vmem:[%s981_s0] sm:$0xff]  ;;  %v717_v21 = vld [vmem:[%s986_s5 + $0x38] sm:$0xff]   ;;  %v716_v22 = vld [vmem:[#allocation7 + $0x30] sm:$0xff]  }
  0x39   :  { %613 = vmatpush3.bf16.msra.mxu0 %v701_v3  ;;  %633 = vmatpush3.bf16.msra.mxu1 %v702_v4  ;;  %v84_v18 = vld [vmem:[%s982_s1] sm:$0xf]  ;;  %v86_v20 = vpack.c.bf16 %v85_v17, %v85_v17  ;;  %v719_v23 = vld [vmem:[%s986_s5 + $0x30] sm:$0xff]   ;;  %v718_v24 = vld [vmem:[#allocation7 + $0x28] sm:$0xff]  }
  0x3a   :  { %614 = vmatprep.subr.bf16.mxu0 %v845_v0  ;;  %634 = vmatprep.subr.bf16.mxu1 %v845_v0  ;;  %v721_v25 = vld [vmem:[%s986_s5 + $0x28] sm:$0xff]   ;;  %v720_v26 = vld [vmem:[#allocation7 + $0x20] sm:$0xff]   ;;  %v722_v28 = vld [vmem:[#allocation7 + $0x18] sm:$0xff]  }
  0x3b   :  { %v723_v27 = vld [vmem:[%s986_s5 + $0x20] sm:$0xff]   ;;  %v725_v29 = vld [vmem:[%s986_s5 + $0x18] sm:$0xff]   ;;  %v724_v30 = vld [vmem:[#allocation7 + $0x10] sm:$0xff]  }
  0x3c   :  { %v727_v31 = vld [vmem:[%s986_s5 + $0x10] sm:$0xff]   ;;  %v726_v32 = vld [vmem:[#allocation7 + $0x8] sm:$0xff]   ;;  %v728_v33 = vld [vmem:[#allocation7] sm:$0xff]  }
  0x3d   :  { %615 = vmatpush3.bf16.msra.mxu0 %v703_v5  ;;  %635 = vmatpush3.bf16.msra.mxu1 %v704_v6  ;;  %v729_v34 = vld [vmem:[%s986_s5 + $0x8] sm:$0xff]   ;;  %v730_v35 = vld [vmem:[%s986_s5] sm:$0xff]  }
  0x3e   :  { %616 = vmatprep.subr.bf16.mxu0 %v845_v0  ;;  %636 = vmatprep.subr.bf16.mxu1 %v845_v0  ;;  %v556_v38 = vld [vmem:[%s985_s4] ss:$0 sm:$0xff]  ;;  %s847_s4 = smov [#allocation10]  }
  0x3f   :  { %v573_v54 = vld [vmem:[#allocation8] ss:$0 sm:$0xff]  ;;  %s529_s5 = sshll.u32 %s847_s4, 4  ;;  %s530_s5 = int_to_ptr.vmem [resolvable:$true] %s529_s5 }
  0x40   :  { %s811_s3 = scalar_lea.vmem %s530_s5, 128  ;;  %p816_p7 = scmp.lt.s32.totalorder %s530_s5, %s530_s5 }
  0x41   :  { %617 = vmatpush3.bf16.msra.mxu0 %v705_v7  ;;  %637 = vmatpush3.bf16.msra.mxu1 %v706_v8  ;;  %p812_p6 = scmp.ne.s32.totalorder %s530_s5, %s811_s3  ;;  %p817_p8 = scmp.lt.s32.totalorder %s811_s3, %s811_s3 }
  0x42   :  { %618 = vmatprep.subr.bf16.mxu0 %v845_v0  ;;  %638 = vmatprep.subr.bf16.mxu1 %v845_v0 }
  0x43   :  { %p818_p9 = por %p817_p8, %p816_p7 }
  0x45   :  { %619 = vmatpush3.bf16.msra.mxu0 %v707_v9  ;;  %639 = vmatpush3.bf16.msra.mxu1 %v708_v10  ;;  %p819_p10 = pnand %p818_p9, %p812_p6 }
  0x46   :  { %620 = vmatprep.subr.bf16.mxu0 %v845_v0  ;;  %640 = vmatprep.subr.bf16.mxu1 %v845_v0 }
  0x49   :  { %621 = vmatpush3.bf16.msra.mxu0 %v709_v11  ;;  %641 = vmatpush3.bf16.msra.mxu1 %v710_v12 }
  0x4a   :  { %622 = vmatprep.subr.bf16.mxu0 %v845_v0  ;;  %642 = vmatprep.subr.bf16.mxu1 %v845_v0 }
  0x4d   :  { %623 = vmatpush3.bf16.msra.mxu0 %v711_v13  ;;  %643 = vmatpush3.bf16.msra.mxu1 %v712_v14 }
  0x4e   :  { %624 = vmatprep.subr.bf16.mxu0 %v845_v0  ;;  %644 = vmatprep.subr.bf16.mxu1 %v845_v0 }
  0x51   :  { %625 = vmatpush3.bf16.msra.mxu0 %v713_v15  ;;  %645 = vmatpush3.bf16.msra.mxu1 %v714_v16 }
  0x52   :  { %650 = vmatprep.subr.bf16.mxu0 %v845_v0  ;;  %670 = vmatprep.subr.bf16.mxu1 %v845_v0 }
  0x54   :  { %627 = vmatmul.mubr.bf16.vlgmr.msra.gmra.mxu0 %v84_v18  ;;  %647 = vmatmul.mubr.bf16.vlgmr.msra.gmra.mxu1 %v86_v20 }
  0x55   :  { %651 = vmatpush3.bf16.msra.mxu0 %v715_v19  ;;  %671 = vmatpush3.bf16.msra.mxu1 %v717_v21 }
  0x56   :  { %652 = vmatprep.subr.bf16.mxu0 %v845_v0  ;;  %672 = vmatprep.subr.bf16.mxu1 %v845_v0 }
  0x57   :  { %666 = vmatprep.mubr.msk.bf16.mxu0 %vm846_vm0, %v845_v0  ;;  %686 = vmatprep.mubr.msk.bf16.mxu1 %vm846_vm0, %v845_v0 }
  0x59   :  { %653 = vmatpush3.bf16.msra.mxu0 %v716_v22  ;;  %673 = vmatpush3.bf16.msra.mxu1 %v719_v23 }
  0x5a   :  { %654 = vmatprep.subr.bf16.mxu0 %v845_v0  ;;  %674 = vmatprep.subr.bf16.mxu1 %v845_v0 }
  0x5d   :  { %655 = vmatpush3.bf16.msra.mxu0 %v718_v24  ;;  %675 = vmatpush3.bf16.msra.mxu1 %v721_v25 }
  0x5e   :  { %656 = vmatprep.subr.bf16.mxu0 %v845_v0  ;;  %676 = vmatprep.subr.bf16.mxu1 %v845_v0 }
  0x61   :  { %657 = vmatpush3.bf16.msra.mxu0 %v720_v26  ;;  %677 = vmatpush3.bf16.msra.mxu1 %v723_v27 }
  0x62   :  { %658 = vmatprep.subr.bf16.mxu0 %v845_v0  ;;  %678 = vmatprep.subr.bf16.mxu1 %v845_v0 }
  0x65   :  { %659 = vmatpush3.bf16.msra.mxu0 %v722_v28  ;;  %679 = vmatpush3.bf16.msra.mxu1 %v725_v29 }
  0x66   :  { %660 = vmatprep.subr.bf16.mxu0 %v845_v0  ;;  %680 = vmatprep.subr.bf16.mxu1 %v845_v0 }
  0x69   :  { %661 = vmatpush3.bf16.msra.mxu0 %v724_v30  ;;  %681 = vmatpush3.bf16.msra.mxu1 %v727_v31 }
  0x6a   :  { %662 = vmatprep.subr.bf16.mxu0 %v845_v0  ;;  %682 = vmatprep.subr.bf16.mxu1 %v845_v0 }
  0x6d   :  { %663 = vmatpush3.bf16.msra.mxu0 %v726_v32  ;;  %683 = vmatpush3.bf16.msra.mxu1 %v729_v34 }
  0x6e   :  { %664 = vmatprep.subr.bf16.mxu0 %v845_v0  ;;  %684 = vmatprep.subr.bf16.mxu1 %v845_v0 }
  0x71   :  { %665 = vmatpush3.bf16.msra.mxu0 %v728_v33  ;;  %685 = vmatpush3.bf16.msra.mxu1 %v730_v35 }
  0x74   :  { %667 = vmatmul.mubr.bf16.vlgmr.msra.gmra.mxu0 %v84_v18 }
 0x114   :  { %v201_v36 = vpop.f32.mrf.mxu0  ;;  %v289_v37 = vpop.f32.mrf.mxu1 }
 0x115   :  { %v290_v39 = vadd.f32 %v289_v37, %v201_v36 }
 0x116   :  { %v628_v40 = vpop.f32.mrf.mxu0  ;;  %v648_v41 = vpop.f32.mrf.mxu1 }
 0x117   :  { %v302_v42 = vadd.f32 %v556_v38, %v290_v39 }
 0x118   :  { %v204_v43 = vpop.f32.mrf.mxu0  ;;  %v292_v44 = vpop.f32.mrf.mxu1 }
 0x119   :  { %v303_v45 = vmax.f32 %v302_v42, 0.0 }
 0x11a   :  { %v629_v46 = vpop.f32.mrf.mxu0  ;;  %v649_v47 = vpop.f32.mrf.mxu1 }
 0x11b   :  { %v304_v48 = vpack.c.bf16 %v303_v45, %v303_v45 }
 0x11d   :  { %687 = vmatmul.mubr.bf16.vlgmr.msra.gmra.mxu1 %v304_v48 }
 0x134   :  { %v419_v49 = vpop.f32.mrf.mxu0 }
 0x136   :  { %v668_v50 = vpop.f32.mrf.mxu0 }
 0x138   :  { %v422_v51 = vpop.f32.mrf.mxu0 }
 0x13a   :  { %v669_v52 = vpop.f32.mrf.mxu0 }
 0x1dd   :  { %v507_v53 = vpop.f32.mrf.mxu1 }
 0x1de   :  { %v508_v55 = vadd.f32 %v507_v53, %v419_v49 }
 0x1df   :  { %v688_v56 = vpop.f32.mrf.mxu1 }
 0x1e0   :  { %v520_v57 = vadd.f32 %v573_v54, %v508_v55 }
 0x1e1   :  { %v510_v58 = vpop.f32.mrf.mxu1 }
 0x1e2   :  { %v521_v59 = vmax.f32 %v520_v57, 0.0 }
 0x1e3   :  { %v689_v60 = vpop.f32.mrf.mxu1 }
 0x1e4   :  { %522 = vst [vmem:[#allocation10] sm:$0xff] %v521_v59 }
 0x1e5   :  { %822 = shalt.err (!%p819_p10)
}
 0x1e6   :  { %532 = dma.vmem_to_hbm [thread:$0]  %s530_s5, 128, %s989_s8, [#allocation4]  }
 0x1e7   :  { %837 = dma.done.wait [#allocation4], 128  }
 0x1e8   :  { %838 = vsyncadd [#allocation4], 4294967168 }
 0x1e9   :  { %536 = vsyncpa [#allocation3], 1 }
 0x1ea   :  { %537 = vsyncpa [#allocation6], 1 }
 0x1eb   :  { %538 = vsyncpa [#allocation9], 1 }
 0x1ec   :  { %539 = vsyncpa [#allocation4], 1 }

</bundles_post_ra>
